<compile_context>
chip_gen: v7x
topology: tpu7x:2x2x1
jax: 0.10.0
libtpu: 0.0.40
codegen_flags: <defaults>
</compile_context>

<pallas_src>
import functools

import jax
import jax.numpy as jnp
from jax.experimental import pallas as pl
from jax.experimental.pallas import tpu as pltpu

input_size = 4
hidden_size = 10
num_classes = 3

GROUP = 32                            # batch rows packed per 128-lane row
PACKED_IN = GROUP * input_size        # 128  (lane-dense input)
PACKED_HID = GROUP * hidden_size      # 320
PACKED_OUT = GROUP * num_classes      # 96


def _fcn_kernel(x_ref, w1_ref, b1_ref, w2_ref, b2_ref, o_ref):
    # x_ref: (tile, 128) lane-dense slab of 32*tile original rows.
    # Weights/biases are block-diagonal replicated and VMEM-resident.
    x = x_ref[...]                                                   # (tile, 128)
    h = jnp.dot(x, w1_ref[...], preferred_element_type=jnp.float32)  # (tile, 320) MXU
    h = jnp.maximum(h + b1_ref[...], 0.0)                            # bias + ReLU (VPU filler)
    y = jnp.dot(h, w2_ref[...], preferred_element_type=jnp.float32)  # (tile, 96)  MXU
    o_ref[...] = (y + b2_ref[...]).astype(o_ref.dtype)


def prepare_params(w1, b1, w2, b2):
    """One-time parameter prep (outside the per-call hot path).

    PyTorch layout: w1 (hidden, in), w2 (classes, hidden).
    Packed layout: GROUP-way block-diagonal replication of W^T so that
    group g of a packed row (lanes [4g:4g+4]) maps to output lanes
    [10g:10g+10] / [3g:3g+3], i.e. y = x_packed @ W_bd + b_bd.
    """
    eye = jnp.eye(GROUP, dtype=jnp.float32)
    w1_bd = jnp.kron(eye, jnp.transpose(w1).astype(jnp.float32))   # (128, 320)
    w2_bd = jnp.kron(eye, jnp.transpose(w2).astype(jnp.float32))   # (320, 96)
    b1_bd = jnp.tile(b1.astype(jnp.float32), (GROUP,)).reshape(1, PACKED_HID)
    b2_bd = jnp.tile(b2.astype(jnp.float32), (GROUP,)).reshape(1, PACKED_OUT)
    return w1_bd, b1_bd, w2_bd, b2_bd


def _pick_tile(num_packed_rows, max_packed_rows):
    """Batch tile in packed rows: sublane multiple (or full extent), large
    enough to amortize per-step overhead, but capped near cdiv(R, 2) so the
    grid keeps >= 2 'parallel' steps for v7x's two TensorCores."""
    max_tile = max(8, (max_packed_rows // 8) * 8)
    r = num_packed_rows
    if r <= 8:
        return r                                   # single full-extent block
    half = -(-r // 2)                              # cdiv(R, 2)
    half = -(-half // 8) * 8                       # round up to sublane multiple
    return max(8, min(max_tile, half))


@functools.partial(jax.jit, static_argnames=("max_packed_rows",))
def fcn_forward(x, params, *, max_packed_rows=2048):
    """x: (B, input_size) f32, params from prepare_params().
    Returns (B, num_classes) f32, matching PyTorch FCN.forward."""
    w1_bd, b1_bd, w2_bd, b2_bd = params
    B = x.shape[0]

    # Pad only the GROUP remainder (<= 31 rows) so the packing reshape is a
    # free metadata reshape of contiguous rows. No tile-multiple padding.
    B_pad = -(-B // GROUP) * GROUP
    if B_pad != B:
        x = jnp.pad(x, ((0, B_pad - B), (0, 0)))
    R = B_pad // GROUP
    xp = x.reshape(R, PACKED_IN)                   # lane-dense packed activations

    tile = _pick_tile(R, max_packed_rows)
    grid = (pl.cdiv(R, tile),)                     # ragged last tile handled by Pallas

    flops = 2 * R * (PACKED_IN * PACKED_HID + PACKED_HID * PACKED_OUT)
    bytes_accessed = 4 * (R * (PACKED_IN + PACKED_OUT)
                          + PACKED_IN * PACKED_HID + PACKED_HID * PACKED_OUT
                          + PACKED_HID + PACKED_OUT)

    out_packed = pl.pallas_call(
        _fcn_kernel,
        out_shape=jax.ShapeDtypeStruct((R, PACKED_OUT), jnp.float32),
        grid=grid,
        in_specs=[
            # Activations: tiled & double-buffered over the batch grid.
            pl.BlockSpec((tile, PACKED_IN), lambda i: (i, 0)),
            # Weights / biases: constant index_map -> fetched once, resident.
            pl.BlockSpec((PACKED_IN, PACKED_HID), lambda i: (0, 0)),
            pl.BlockSpec((1, PACKED_HID), lambda i: (0, 0)),
            pl.BlockSpec((PACKED_HID, PACKED_OUT), lambda i: (0, 0)),
            pl.BlockSpec((1, PACKED_OUT), lambda i: (0, 0)),
        ],
        out_specs=pl.BlockSpec((tile, PACKED_OUT), lambda i: (i, 0)),
        compiler_params=pltpu.CompilerParams(
            dimension_semantics=("parallel",),     # megacore sharding on v7x
        ),
        cost_estimate=pl.CostEstimate(flops=flops, transcendentals=0,
                                      bytes_accessed=bytes_accessed),
    )(xp, w1_bd, b1_bd, w2_bd, b2_bd)

    out = out_packed.reshape(B_pad, num_classes)   # free unpack (contiguous)
    if B_pad != B:
        out = out[:B]
    return out


def _init_params(key):
    # PyTorch nn.Linear default init: U(-1/sqrt(fan_in), 1/sqrt(fan_in)).
    k1, k2, k3, k4 = jax.random.split(key, 4)
    lim1 = 1.0 / jnp.sqrt(jnp.float32(input_size))
    lim2 = 1.0 / jnp.sqrt(jnp.float32(hidden_size))
    w1 = jax.random.uniform(k1, (hidden_size, input_size), jnp.float32, -lim1, lim1)
    b1 = jax.random.uniform(k2, (hidden_size,), jnp.float32, -lim1, lim1)
    w2 = jax.random.uniform(k3, (num_classes, hidden_size), jnp.float32, -lim2, lim2)
    b2 = jax.random.uniform(k4, (num_classes,), jnp.float32, -lim2, lim2)
    return w1, b1, w2, b2


if __name__ == "__main__":
    key = jax.random.PRNGKey(0)
    k_params, k_x1, k_x2, k_x3 = jax.random.split(key, 4)
    w1, b1, w2, b2 = _init_params(k_params)
    params = prepare_params(w1, b1, w2, b2)        # one-time, outside hot path

    def reference(x):
        # f32 reference (HIGHEST precision); tolerance below covers the MXU's
        # f32-matmul emulation path.
        h = jnp.maximum(jnp.dot(x, w1.T, precision=jax.lax.Precision.HIGHEST) + b1, 0.0)
        return jnp.dot(h, w2.T, precision=jax.lax.Precision.HIGHEST) + b2

    # Case 1: tiny batch (GROUP-remainder padding, single packed row).
    x1 = jax.random.normal(k_x1, (8, input_size), jnp.float32)
    out1 = jax.block_until_ready(fcn_forward(x1, params))
    assert out1.shape == (8, num_classes)
    assert jnp.allclose(out1, reference(x1), atol=1e-2, rtol=1e-3)

    # Case 2: batch not a multiple of GROUP, single-tile grid.
    x2 = jax.random.normal(k_x2, (200, input_size), jnp.float32)
    out2 = jax.block_until_ready(fcn_forward(x2, params))
    assert out2.shape == (200, num_classes)
    assert jnp.allclose(out2, reference(x2), atol=1e-2, rtol=1e-3)

    # Case 3: multi-step grid with a ragged last tile (small tile just for
    # test coverage; also verifies the block-diagonal packing/unpacking order).
    x3 = jax.random.normal(k_x3, (1056, input_size), jnp.float32)   # R = 33 packed rows
    out3 = jax.block_until_ready(fcn_forward(x3, params, max_packed_rows=8))
    assert out3.shape == (1056, num_classes)
    assert jnp.allclose(out3, reference(x3), atol=1e-2, rtol=1e-3)

    print("KERNEL_OK")
</pallas_src>

<mosaic_0001>
module attributes {stable_mosaic.version = 11 : i64} {
  func.func @_fcn_kernel(%arg0: i32, %arg1: memref<1x128xf32, #tpu.memory_space<vmem>>, %arg2: memref<128x320xf32, #tpu.memory_space<vmem>>, %arg3: memref<1x320xf32, #tpu.memory_space<vmem>>, %arg4: memref<320x96xf32, #tpu.memory_space<vmem>>, %arg5: memref<1x96xf32, #tpu.memory_space<vmem>>, %arg6: memref<1x96xf32, #tpu.memory_space<vmem>>) attributes {dimension_semantics = [#tpu.dimension_semantics<parallel>], iteration_bounds = array<i64: 1>, scalar_prefetch = 0 : i64, scratch_operands = 0 : i64, tpu.core_type = #tpu.core_type<tc>, window_params = [{transform_indices = @transform_0, window_bounds = array<i64: 1, 128>}, {pipeline_mode = #tpu.pipeline_mode<synchronous>, transform_indices = @transform_1, window_bounds = array<i64: 128, 320>}, {pipeline_mode = #tpu.pipeline_mode<synchronous>, transform_indices = @transform_2, window_bounds = array<i64: 1, 320>}, {pipeline_mode = #tpu.pipeline_mode<synchronous>, transform_indices = @transform_3, window_bounds = array<i64: 320, 96>}, {pipeline_mode = #tpu.pipeline_mode<synchronous>, transform_indices = @transform_4, window_bounds = array<i64: 1, 96>}, {transform_indices = @transform_5, window_bounds = array<i64: 1, 96>}]} {
    %c0 = arith.constant 0 : index
    %c0_0 = arith.constant 0 : index
    %0 = vector.load %arg1[%c0, %c0_0] : memref<1x128xf32, #tpu.memory_space<vmem>>, vector<1x128xf32>
    %c0_1 = arith.constant 0 : index
    %c0_2 = arith.constant 0 : index
    %1 = vector.load %arg2[%c0_1, %c0_2] : memref<128x320xf32, #tpu.memory_space<vmem>>, vector<128x320xf32>
    %cst = arith.constant dense<0.000000e+00> : vector<1x320xf32>
    %2 = tpu.matmul %0, %1, %cst {dimension_numbers = #tpu.dot_dimension_numbers<[1], [0], [0], [1], [0, 0, 1, 1], [], []>} : vector<1x128xf32>, vector<128x320xf32>, vector<1x320xf32> -> vector<1x320xf32>
    %c0_3 = arith.constant 0 : index
    %c0_4 = arith.constant 0 : index
    %3 = vector.load %arg3[%c0_3, %c0_4] : memref<1x320xf32, #tpu.memory_space<vmem>>, vector<1x320xf32>
    %4 = arith.addf %2, %3 : vector<1x320xf32>
    %cst_5 = arith.constant 0.000000e+00 : f32
    %5 = vector.broadcast %cst_5 : f32 to vector<1x320xf32>
    %6 = arith.maximumf %4, %5 : vector<1x320xf32>
    %c0_6 = arith.constant 0 : index
    %c0_7 = arith.constant 0 : index
    %7 = vector.load %arg4[%c0_6, %c0_7] : memref<320x96xf32, #tpu.memory_space<vmem>>, vector<320x96xf32>
    %cst_8 = arith.constant dense<0.000000e+00> : vector<1x96xf32>
    %8 = tpu.matmul %6, %7, %cst_8 {dimension_numbers = #tpu.dot_dimension_numbers<[1], [0], [0], [1], [0, 0, 1, 1], [], []>} : vector<1x320xf32>, vector<320x96xf32>, vector<1x96xf32> -> vector<1x96xf32>
    %c0_9 = arith.constant 0 : index
    %c0_10 = arith.constant 0 : index
    %9 = vector.load %arg5[%c0_9, %c0_10] : memref<1x96xf32, #tpu.memory_space<vmem>>, vector<1x96xf32>
    %10 = arith.addf %8, %9 : vector<1x96xf32>
    %c0_11 = arith.constant 0 : index
    %c0_12 = arith.constant 0 : index
    %11 = vector.load %arg6[%c0_11, %c0_12] : memref<1x96xf32, #tpu.memory_space<vmem>>, vector<1x96xf32>
    tpu.vector_store %arg6[%c0_11, %c0_12], %10 {strides = array<i32>} : memref<1x96xf32, #tpu.memory_space<vmem>>, vector<1x96xf32>,
    return
  }
  func.func @transform_0(%arg0: i32) -> (i32, i32) {
    %c0_i32 = arith.constant 0 : i32
    %c0_i32_0 = arith.constant 0 : i32
    return %arg0, %c0_i32 : i32, i32
  }
  func.func @transform_1(%arg0: i32) -> (i32, i32) {
    %c0_i32 = arith.constant 0 : i32
    %c0_i32_0 = arith.constant 0 : i32
    %c0_i32_1 = arith.constant 0 : i32
    return %c0_i32, %c0_i32_0 : i32, i32
  }
  func.func @transform_2(%arg0: i32) -> (i32, i32) {
    %c0_i32 = arith.constant 0 : i32
    %c0_i32_0 = arith.constant 0 : i32
    %c0_i32_1 = arith.constant 0 : i32
    return %c0_i32, %c0_i32_0 : i32, i32
  }
  func.func @transform_3(%arg0: i32) -> (i32, i32) {
    %c0_i32 = arith.constant 0 : i32
    %c0_i32_0 = arith.constant 0 : i32
    %c0_i32_1 = arith.constant 0 : i32
    return %c0_i32, %c0_i32_0 : i32, i32
  }
  func.func @transform_4(%arg0: i32) -> (i32, i32) {
    %c0_i32 = arith.constant 0 : i32
    %c0_i32_0 = arith.constant 0 : i32
    %c0_i32_1 = arith.constant 0 : i32
    return %c0_i32, %c0_i32_0 : i32, i32
  }
  func.func @transform_5(%arg0: i32) -> (i32, i32) {
    %c0_i32 = arith.constant 0 : i32
    %c0_i32_0 = arith.constant 0 : i32
    return %arg0, %c0_i32 : i32, i32
  }
}

</mosaic_0001>

<bundles_post_ra>
// kernel: fcn_forward.1
= control target key start
LH: loop header
LB: loop body
LE: loop exit
PB: predicated region body
PF: predicated region fallthrough
CT: control target
= control target key end

     0   :  { %v640_v3 = vmov 0.0|0.0   ;;  %v641_v4 = vmov 0.0   ;;  %vm642_vm0 = vmmov 0   ;;  %vm271_vm1 = vcmask 523264   ;;  %s966_s1 = inlined_call_operand.vmem [shape: f32[128,320], index: 1, kind: input, shape index: {}]   ;;  %s967_s3 = inlined_call_operand.vmem [shape: f32[320,96], index: 3, kind: input, shape index: {}]   ;;  %s968_s0 = inlined_call_operand.vmem [shape: f32[1,128], index: 0, kind: input, shape index: {}]   ;;  %s969_s2 = inlined_call_operand.vmem [shape: f32[1,320], index: 2, kind: input, shape index: {}]   ;;  %s970_s4 = inlined_call_operand.vmem [shape: f32[1,96], index: 4, kind: input, shape index: {}]   ;;  %s971_s5 = inlined_call_operand.vmem [shape: f32[1,96], index: 5, kind: output, shape index: {}]  }
   0x1   :  { %v22_v0 = vld [vmem:[%s966_s1 + $0x8] sm:$0xff]  ;;  %v25_v1 = vld [vmem:[%s966_s1 + $0x20] sm:$0xff]  ;;  %569 = vmatprep.subr.bf16.mxu1 %v640_v3  ;;  %150 = vmatprep.mubr.f32.mxu0 %v641_v4  ;;  %v24_v6 = vld [vmem:[%s966_s1 + $0x18] sm:$0xff]  ;;  %vm415_vm2 = vcmask 778240  }
   0x2   :  { %v21_v2 = vld [vmem:[%s966_s1] sm:$0xff]  ;;  %v537_v5 = vpack.c.bf16 %v25_v1, %v22_v0  ;;  %v28_v7 = vld [vmem:[%s966_s1 + $0x38] sm:$0xff]  ;;  %v31_v8 = vld [vmem:[%s966_s1 + $0x50] sm:$0xff]  ;;  %515 = vmatprep.mubr.msk.f32.mxu1 %vm642_vm0, %v641_v4 }
   0x3   :  { %v539_v9 = vpack.c.bf16 %v24_v6, %v21_v2  ;;  %v541_v10 = vpack.c.bf16 %v31_v8, %v28_v7  ;;  %v27_v11 = vld [vmem:[%s966_s1 + $0x30] sm:$0xff]  ;;  %v30_v12 = vld [vmem:[%s966_s1 + $0x48] sm:$0xff]  ;;  %v37_v16 = vld [vmem:[%s966_s1 + $0x80] sm:$0xff] }
   0x4   :  { %v23_v13 = vld [vmem:[%s966_s1 + $0x10] sm:$0xff]  ;;  %538 = vmatprep.subr.bf16.mxu0 %v537_v5  ;;  %v26_v14 = vld [vmem:[%s966_s1 + $0x28] sm:$0xff]  ;;  %v543_v17 = vpack.c.bf16 %v30_v12, %v27_v11  ;;  %v29_v19 = vld [vmem:[%s966_s1 + $0x40] sm:$0xff] }
   0x5   :  { %v34_v15 = vld [vmem:[%s966_s1 + $0x68] sm:$0xff]  ;;  %540 = vmatpush1.bf16.msra.mxu0 %v539_v9  ;;  %v570_v18 = vpack.c.bf16 %v26_v14, %v23_v13  ;;  %v33_v21 = vld [vmem:[%s966_s1 + $0x60] sm:$0xff]  ;;  %v36_v22 = vld [vmem:[%s966_s1 + $0x78] sm:$0xff] }
   0x6   :  { %542 = vmatprep.subr.bf16.mxu0 %v541_v10  ;;  %v545_v20 = vpack.c.bf16 %v37_v16, %v34_v15  ;;  %v32_v23 = vld [vmem:[%s966_s1 + $0x58] sm:$0xff]  ;;  %v43_v26 = vld [vmem:[%s966_s1 + $0xb0] sm:$0xff]  ;;  %v38_v28 = vld [vmem:[%s966_s1 + $0x88] sm:$0xff]  ;;  %v547_v29 = vpack.c.bf16 %v36_v22, %v33_v21 }
   0x7   :  { %571 = vmatpush3.bf16.msra.mxu1 %v570_v18  ;;  %v573_v24 = vpack.c.bf16 %v32_v23, %v29_v19  ;;  %v40_v25 = vld [vmem:[%s966_s1 + $0x98] sm:$0xff]  ;;  %v35_v27 = vld [vmem:[%s966_s1 + $0x70] sm:$0xff]  ;;  %v42_v32 = vld [vmem:[%s966_s1 + $0xa8] sm:$0xff] }
   0x8   :  { %572 = vmatprep.subr.bf16.mxu1 %v640_v3  ;;  %v549_v30 = vpack.c.bf16 %v43_v26, %v40_v25  ;;  %v39_v31 = vld [vmem:[%s966_s1 + $0x90] sm:$0xff]  ;;  %v576_v33 = vpack.c.bf16 %v38_v28, %v35_v27  ;;  %v46_v34 = vld [vmem:[%s966_s1 + $0xc8] sm:$0xff]  ;;  %v49_v35 = vld [vmem:[%s966_s1 + $0xe0] sm:$0xff] }
   0x9   :  { %544 = vmatpush1.bf16.msra.mxu0 %v543_v17  ;;  %v41_v36 = vld [vmem:[%s966_s1 + $0xa0] sm:$0xff]  ;;  %v44_v37 = vld [vmem:[%s966_s1 + $0xb8] sm:$0xff]  ;;  %v551_v38 = vpack.c.bf16 %v42_v32, %v39_v31  ;;  %v553_v39 = vpack.c.bf16 %v49_v35, %v46_v34  ;;  %v55_v44 = vld [vmem:[%s966_s1 + $0x110] sm:$0xff] }
   0xa   :  { %546 = vmatprep.subr.bf16.mxu0 %v545_v20  ;;  %v45_v40 = vld [vmem:[%s966_s1 + $0xc0] sm:$0xff]  ;;  %v48_v41 = vld [vmem:[%s966_s1 + $0xd8] sm:$0xff]  ;;  %v579_v42 = vpack.c.bf16 %v44_v37, %v41_v36  ;;  %v47_v45 = vld [vmem:[%s966_s1 + $0xd0] sm:$0xff] }
   0xb   :  { %574 = vmatpush3.bf16.msra.mxu1 %v573_v24  ;;  %v52_v43 = vld [vmem:[%s966_s1 + $0xf8] sm:$0xff]  ;;  %v50_v46 = vld [vmem:[%s966_s1 + $0xe8] sm:$0xff]  ;;  %v555_v47 = vpack.c.bf16 %v48_v41, %v45_v40  ;;  %v51_v49 = vld [vmem:[%s966_s1 + $0xf0] sm:$0xff] }
   0xc   :  { %575 = vmatprep.subr.bf16.mxu1 %v640_v3  ;;  %v557_v48 = vpack.c.bf16 %v55_v44, %v52_v43  ;;  %v54_v50 = vld [vmem:[%s966_s1 + $0x108] sm:$0xff]  ;;  %v582_v51 = vpack.c.bf16 %v50_v46, %v47_v45  ;;  %v61_v53 = vld [vmem:[%s966_s1 + $0x140] sm:$0xff]  ;;  %v56_v55 = vld [vmem:[%s966_s1 + $0x118] sm:$0xff] }
   0xd   :  { %548 = vmatpush1.bf16.msra.mxu0 %v547_v29  ;;  %v58_v52 = vld [vmem:[%s966_s1 + $0x128] sm:$0xff]  ;;  %v53_v54 = vld [vmem:[%s966_s1 + $0x100] sm:$0xff]  ;;  %v559_v56 = vpack.c.bf16 %v54_v50, %v51_v49  ;;  %v60_v59 = vld [vmem:[%s966_s1 + $0x138] sm:$0xff] }
   0xe   :  { %550 = vmatprep.subr.bf16.mxu0 %v549_v30  ;;  %v561_v57 = vpack.c.bf16 %v61_v53, %v58_v52  ;;  %v57_v58 = vld [vmem:[%s966_s1 + $0x120] sm:$0xff]  ;;  %v585_v60 = vpack.c.bf16 %v56_v55, %v53_v54  ;;  %v64_v61 = vld [vmem:[%s966_s1 + $0x158] sm:$0xff]  ;;  %v67_v62 = vld [vmem:[%s966_s1 + $0x170] sm:$0xff] }
   0xf   :  { %577 = vmatpush3.bf16.msra.mxu1 %v576_v33  ;;  %v59_v63 = vld [vmem:[%s966_s1 + $0x130] sm:$0xff]  ;;  %v62_v0 = vld [vmem:[%s966_s1 + $0x148] sm:$0xff]  ;;  %v563_v1 = vpack.c.bf16 %v60_v59, %v57_v58  ;;  %v565_v2 = vpack.c.bf16 %v67_v62, %v64_v61  ;;  %v246_v8 = vld [vmem:[%s967_s3 + $0x80] sm:$0xff] }
  0x10   :  { %578 = vmatprep.subr.bf16.mxu1 %v640_v3  ;;  %v63_v5 = vld [vmem:[%s966_s1 + $0x150] sm:$0xff]  ;;  %v66_v6 = vld [vmem:[%s966_s1 + $0x168] sm:$0xff]  ;;  %v588_v7 = vpack.c.bf16 %v62_v0, %v59_v63  ;;  %v65_v10 = vld [vmem:[%s966_s1 + $0x160] sm:$0xff] }
  0x11   :  { %552 = vmatpush1.bf16.msra.mxu0 %v551_v38  ;;  %v247_v9 = vld [vmem:[%s967_s3 + $0x88] sm:$0xff]  ;;  %v68_v11 = vld [vmem:[%s966_s1 + $0x178] sm:$0xff]  ;;  %v567_v12 = vpack.c.bf16 %v66_v6, %v63_v5  ;;  %v230_v14 = vld [vmem:[%s967_s3] sm:$0xff] }
  0x12   :  { %554 = vmatprep.subr.bf16.mxu0 %v553_v39  ;;  %v593_v13 = vpack.c.bf16 %v247_v9, %v246_v8  ;;  %v231_v15 = vld [vmem:[%s967_s3 + $0x8] sm:$0xff]  ;;  %v591_v16 = vpack.c.bf16 %v68_v11, %v65_v10  ;;  %v248_v17 = vld [vmem:[%s967_s3 + $0x90] sm:$0xff]  ;;  %v249_v18 = vld [vmem:[%s967_s3 + $0x98] sm:$0xff]  ;;  %v71_v10 = vlaneseq }
  0x13   :  { %580 = vmatpush3.bf16.msra.mxu1 %v579_v42  ;;  %v262_v19 = vld [vmem:[%s967_s3 + $0x100] sm:$0xff]  ;;  %v263_v20 = vld [vmem:[%s967_s3 + $0x108] sm:$0xff]  ;;  %v595_v22 = vpack.c.bf16 %v231_v15, %v230_v14  ;;  %v597_v23 = vpack.c.bf16 %v249_v18, %v248_v17  ;;  %v232_v24 = vld [vmem:[%s967_s3 + $0x10] sm:$0xff] }
  0x14   :  { %581 = vmatprep.subr.bf16.mxu1 %v640_v3  ;;  %v20_v21 = vld [vmem:[%s968_s0] sm:$0x1]  ;;  %v233_v25 = vld [vmem:[%s967_s3 + $0x18] sm:$0xff]  ;;  %v251_v27 = vld [vmem:[%s967_s3 + $0xa8] sm:$0xff]  ;;  %v626_v28 = vpack.c.bf16 %v263_v20, %v262_v19  ;;  %v72_v11 = vshrl.u32 %v71_v10, 7 }
  0x15   :  { %556 = vmatpush1.bf16.msra.mxu0 %v555_v47  ;;  %v250_v26 = vld [vmem:[%s967_s3 + $0xa0] sm:$0xff]  ;;  %v599_v29 = vpack.c.bf16 %v233_v25, %v232_v24  ;;  %v235_v32 = vld [vmem:[%s967_s3 + $0x28] sm:$0xff]  ;;  %v252_v33 = vld [vmem:[%s967_s3 + $0xb0] sm:$0xff] }
  0x16   :  { %558 = vmatprep.subr.bf16.mxu0 %v557_v48  ;;  %v601_v30 = vpack.c.bf16 %v251_v27, %v250_v26  ;;  %v234_v31 = vld [vmem:[%s967_s3 + $0x20] sm:$0xff]  ;;  %v253_v34 = vld [vmem:[%s967_s3 + $0xb8] sm:$0xff]  ;;  %v236_v37 = vld [vmem:[%s967_s3 + $0x30] sm:$0xff]  ;;  %v77_v14 = vsub.s32 1, %v72_v11  ;;  %v81_v15 = vsub.s32 2, %v72_v11 }
  0x17   :  { %583 = vmatpush3.bf16.msra.mxu1 %v582_v51  ;;  %v603_v35 = vpack.c.bf16 %v235_v32, %v234_v31  ;;  %v605_v36 = vpack.c.bf16 %v253_v34, %v252_v33  ;;  %v237_v38 = vld [vmem:[%s967_s3 + $0x38] sm:$0xff]  ;;  %v254_v39 = vld [vmem:[%s967_s3 + $0xc0] sm:$0xff]  ;;  %v239_v43 = vld [vmem:[%s967_s3 + $0x48] sm:$0xff] }
  0x18   :  { %584 = vmatprep.subr.bf16.mxu1 %v640_v3  ;;  %v607_v40 = vpack.c.bf16 %v237_v38, %v236_v37  ;;  %v238_v42 = vld [vmem:[%s967_s3 + $0x40] sm:$0xff]  ;;  %v256_v44 = vld [vmem:[%s967_s3 + $0xd0] sm:$0xff]  ;;  %v257_v45 = vld [vmem:[%s967_s3 + $0xd8] sm:$0xff] }
  0x19   :  { %560 = vmatpush1.bf16.msra.mxu0 %v559_v56  ;;  %v611_v46 = vpack.c.bf16 %v239_v43, %v238_v42  ;;  %v613_v47 = vpack.c.bf16 %v257_v45, %v256_v44  ;;  %v240_v48 = vld [vmem:[%s967_s3 + $0x50] sm:$0xff]  ;;  %v241_v49 = vld [vmem:[%s967_s3 + $0x58] sm:$0xff]  ;;  %v258_v50 = vld [vmem:[%s967_s3 + $0xe0] sm:$0xff] }
  0x1a   :  { %562 = vmatprep.subr.bf16.mxu0 %v561_v57  ;;  %v259_v51 = vld [vmem:[%s967_s3 + $0xe8] sm:$0xff]  ;;  %v615_v52 = vpack.c.bf16 %v241_v49, %v240_v48  ;;  %v242_v54 = vld [vmem:[%s967_s3 + $0x60] sm:$0xff]  ;;  %v264_v56 = vld [vmem:[%s967_s3 + $0x110] sm:$0xff] }
  0x1b   :  { %586 = vmatpush3.bf16.msra.mxu1 %v585_v60  ;;  %v617_v53 = vpack.c.bf16 %v259_v51, %v258_v50  ;;  %v243_v55 = vld [vmem:[%s967_s3 + $0x68] sm:$0xff]  ;;  %v265_v58 = vld [vmem:[%s967_s3 + $0x118] sm:$0xff]  ;;  %v260_v60 = vld [vmem:[%s967_s3 + $0xf0] sm:$0xff] }
  0x1c   :  { %587 = vmatprep.subr.bf16.mxu1 %v640_v3  ;;  %v619_v57 = vpack.c.bf16 %v243_v55, %v242_v54  ;;  %v629_v59 = vpack.c.bf16 %v265_v58, %v264_v56  ;;  %v261_v61 = vld [vmem:[%s967_s3 + $0xf8] sm:$0xff]  ;;  %v244_v63 = vld [vmem:[%s967_s3 + $0x70] sm:$0xff]  ;;  %v267_v5 = vld [vmem:[%s967_s3 + $0x128] sm:$0xff] }
  0x1d   :  { %564 = vmatpush1.bf16.msra.mxu0 %v563_v1  ;;  %v621_v62 = vpack.c.bf16 %v261_v61, %v260_v60  ;;  %v245_v0 = vld [vmem:[%s967_s3 + $0x78] sm:$0xff]  ;;  %v266_v1 = vld [vmem:[%s967_s3 + $0x120] sm:$0xff] }
  0x1e   :  { %566 = vmatprep.subr.bf16.mxu0 %v565_v2  ;;  %v623_v2 = vpack.c.bf16 %v245_v0, %v244_v63  ;;  %v632_v6 = vpack.c.bf16 %v267_v5, %v266_v1  ;;  %v269_v8 = vld [vmem:[%s967_s3 + $0x138] sm:$0xff]  ;;  %v270_v31 = vld [vmem:[%s970_s4] sm:$0x1] }
  0x1f   :  { %589 = vmatpush3.bf16.msra.mxu1 %v588_v7  ;;  %v268_v7 = vld [vmem:[%s967_s3 + $0x130] sm:$0xff] }
  0x20   :  { %590 = vmatprep.subr.bf16.mxu1 %v640_v3  ;;  %v635_v9 = vpack.c.bf16 %v269_v8, %v268_v7 }
  0x21   :  { %568 = vmatpush1.bf16.msra.mxu0 %v567_v12  ;;  %v73_v12 = vsub.s32 0, %v72_v11 }
  0x22   :  { %594 = vmatprep.subr.bf16.mxu0 %v593_v13  ;;  %v69_v13 = vld [vmem:[%s969_s2] sm:$0x7] }
  0x23   :  { %592 = vmatpush3.bf16.msra.mxu1 %v591_v16  ;;  %v74_v16 = vrot.slane %v69_v13, %v73_v12  ;;  %v78_v17 = vrot.slane %v69_v13, %v77_v14  ;;  %v82_v18 = vrot.slane %v69_v13, %v81_v15 }
  0x24   :  { %151 = vmatmul.mubr.f32.vlgmr.msra.gmra.mrb[0].mxu0 %v20_v21  ;;  %625 = vmatprep.subr.bf16.mxu1 %v640_v3 }
  0x25   :  { %596 = vmatpush3.bf16.msra.mxu0 %v595_v22 }
  0x26   :  { %516 = vmatmul.mubr.f32.vlgmr.msra.gmra.mrb[0].mxu1 %v20_v21  ;;  %598 = vmatprep.subr.bf16.mxu0 %v597_v23 }
  0x27   :  { %627 = vmatpush3.bf16.msra.mxu1 %v626_v28  ;;  %534 = vmatprep.mubr.msk.f32.mxu1 %vm642_vm0, %v641_v4  ;;  %v255_v4 = vld [vmem:[%s967_s3 + $0xc8] sm:$0xff] }
  0x28   :  { %628 = vmatprep.subr.bf16.mxu1 %v640_v3  ;;  %v609_v41 = vpack.c.bf16 %v255_v4, %v254_v39 }
  0x29   :  { %600 = vmatpush3.bf16.msra.mxu0 %v599_v29 }
  0x2a   :  { %602 = vmatprep.subr.bf16.mxu0 %v601_v30 }
  0x2b   :  { %630 = vmatpush3.bf16.msra.mxu1 %v629_v59 }
  0x2c   :  { %631 = vmatprep.subr.bf16.mxu1 %v640_v3 }
  0x2d   :  { %604 = vmatpush3.bf16.msra.mxu0 %v603_v35 }
  0x2e   :  { %606 = vmatprep.subr.bf16.mxu0 %v605_v36 }
  0x2f   :  { %633 = vmatpush3.bf16.msra.mxu1 %v632_v6 }
  0x30   :  { %634 = vmatprep.subr.bf16.mxu1 %v640_v3 }
  0x31   :  { %608 = vmatpush3.bf16.msra.mxu0 %v607_v40 }
  0x32   :  { %610 = vmatprep.subr.bf16.mxu0 %v609_v41 }
  0x33   :  { %636 = vmatpush3.bf16.msra.mxu1 %v635_v9 }
  0x35   :  { %612 = vmatpush3.bf16.msra.mxu0 %v611_v46 }
  0x36   :  { %614 = vmatprep.subr.bf16.mxu0 %v613_v47 }
  0x39   :  { %616 = vmatpush3.bf16.msra.mxu0 %v615_v52 }
  0x3a   :  { %618 = vmatprep.subr.bf16.mxu0 %v617_v53 }
  0x3d   :  { %620 = vmatpush3.bf16.msra.mxu0 %v619_v57 }
  0x3e   :  { %622 = vmatprep.subr.bf16.mxu0 %v621_v62 }
  0x41   :  { %624 = vmatpush3.bf16.msra.mxu0 %v623_v2 }
  0xf7   :  { %v152_v19 = vpop.f32.mrb[0].mxu0 }
  0xf8   :  { %v153_v20 = vadd.f32 %v152_v19, %v74_v16  ;;  %v154_v21 = vpop.f32.mrb[1].mxu0 }
  0xf9   :  { %v155_v22 = vadd.f32 %v154_v21, %v78_v17  ;;  %v223_v23 = vpop.f32.mrb[0].mxu1 }
  0xfa   :  { %v224_v3 = vadd.f32 %v223_v23, %v82_v18  ;;  %v517_v24 = vpop.f32.mrb[1].mxu1  ;;  %v227_v26 = vmax.f32 %v153_v20, 0.0 }
  0xfb   :  { %v228_v25 = vmax.f32 %v155_v22, 0.0 }
  0xfc   :  { %v229_v27 = vmax.f32 %v224_v3, 0.0 }
  0xfd   :  { %339 = vmatprep.mubr.f32.mxu0 %v228_v25 }
  0xfe   :  { %340 = vmatmul.mubr.f32.vlgmr.msra.gmra.mrb[2].mxu0 %v227_v26  ;;  %535 = vmatmul.mubr.msk.f32.vlgmr.msra.gmra.mrb[2].mxu1 %vm271_vm1, %v229_v27 }
 0x1d1   :  { %v471_v28 = vpop.f32.mrb[2].mxu0  ;;  %v411_v29 = vpop.f32.mrb[2].mxu1 }
 0x1d2   :  { %v472_v30 = vpop.f32.mrb[3].mxu0  ;;  %v536_v32 = vpop.f32.mrb[3].mxu1 }
 0x1d3   :  { %v473_v33 = vadd.f32 %v472_v30, %v471_v28 }
 0x1d5   :  { %v342_v34 = vadd.f32 %v473_v33, %v270_v31 }
 0x1d7   :  { %v412_v35 = vadd.f32 %v411_v29, %v342_v34 }
 0x1d9   :  { %416 = vst.msk [vmem:[%s971_s5] sm:$0x1] %vm415_vm2, %v412_v35 }

</bundles_post_ra>
